<compile_context>
chip_gen: v6e
topology: v6e:2x2x1
jax: 0.10.0
libtpu: 0.0.40
codegen_flags: <defaults>
</compile_context>

<pallas_src>
import functools

import jax
import jax.numpy as jnp
from jax.experimental import pallas as pl
from jax.experimental.pallas import tpu as pltpu


# ----------------------------------------------------------------------------
# Helpers
# ----------------------------------------------------------------------------
def _round_up(x, m):
    return (x + m - 1) // m * m


def _largest_aligned_divisor(total, max_tile, align=128):
    """Largest multiple of `align` that divides `total` and is <= max_tile."""
    best = align
    cand = align
    limit = min(total, max_tile)
    while cand <= limit:
        if total % cand == 0:
            best = cand
        cand += align
    return best


def _vmem_budget_bytes():
    """(vmem_limit_bytes, tile working-set budget) derived per generation."""
    phys = 64 << 20  # conservative (v7x-sized) fallback
    try:
        info = pltpu.get_tpu_info()
        phys = int(getattr(info, "vmem_capacity_bytes", phys)) or phys
    except Exception:
        pass
    # 64 MiB scoped limit on 128-MiB chips (v5e/v6e), 32 MiB on v7x (64 MiB
    # physical); leave 1/4 headroom for Mosaic internals.
    limit = min(phys // 2, 64 << 20)
    return limit, (limit * 3) // 4


_ACTIVATIONS = {
    "relu": lambda y: jnp.maximum(y, 0.0),
    "tanh": jnp.tanh,
    "sigmoid": jax.nn.sigmoid,
    "gelu": jax.nn.gelu,
    "identity": lambda y: y,
}
# TODO(synk): torch's get_func(act) registry may expose more activations than
# the set above; extend _ACTIVATIONS as needed.


# ----------------------------------------------------------------------------
# Kernels
# ----------------------------------------------------------------------------
def _single_k_kernel(act_fn, x_ref, w_ref, b_ref, o_ref):
    """grid_k == 1: no accumulator scratch, write act(dot + bias) directly."""
    acc = jnp.dot(
        x_ref[...].astype(w_ref.dtype), w_ref[...],
        preferred_element_type=jnp.float32,
    )
    o_ref[...] = act_fn(acc + b_ref[...]).astype(o_ref.dtype)


def _multi_k_kernel(act_fn, x_ref, w_ref, b_ref, o_ref, acc_ref):
    """grid_k > 1: f32 accumulator across the innermost (arbitrary) K axis."""
    k = pl.program_id(2)

    @pl.when(k == 0)
    def _init():
        acc_ref[...] = jnp.zeros_like(acc_ref)

    acc_ref[...] += jnp.dot(
        x_ref[...].astype(w_ref.dtype), w_ref[...],
        preferred_element_type=jnp.float32,
    )

    @pl.when(k == pl.num_programs(2) - 1)
    def _finalize():
        o_ref[...] = act_fn(acc_ref[...] + b_ref[...]).astype(o_ref.dtype)


# ----------------------------------------------------------------------------
# Parameter preparation (one-time: weights/bias are static module state)
# ----------------------------------------------------------------------------
def prepare_mlp_params(w_t, b, *, compute_dtype=jnp.bfloat16, k_whole_max=2048):
    """Cast + pad the (static) weight/bias once, outside the hot path.

    w_t: (d_in, size) = torch weight transposed; b: (size,).
    Returns (w_prep (k_pad, n_pad) compute_dtype, b_prep (1, n_pad) float32).
    """
    d_in, size = w_t.shape
    n_pad = _round_up(size, 128)
    k_pad = d_in if d_in <= k_whole_max else _round_up(d_in, 128)
    # TODO(synk): optional v7x-only fp8 weight path (halves W HBM bytes on a
    # bandwidth-bound MLP); needs a scaling/quant scheme, not a plain cast.
    wc = w_t.astype(compute_dtype)
    if (k_pad, n_pad) != (d_in, size):
        wc = jnp.pad(wc, ((0, k_pad - d_in), (0, n_pad - size)))
    bp = jnp.pad(b.astype(jnp.float32), (0, n_pad - size)).reshape(1, n_pad)
    return wc, bp


# ----------------------------------------------------------------------------
# Main entry points
# ----------------------------------------------------------------------------
def basic_mlp_block_prepared(
    x,
    w_prep,
    b_prep,
    *,
    d_in,
    size,
    act="relu",
    out_dtype=None,
    tile_m=1024,
    tile_n=512,
    tile_k=512,
    k_whole_max=2048,
):
    """act(x @ W.T + b) with pre-prepared (cast + padded) weight/bias."""
    M, x_d = x.shape
    assert x_d == d_in, (x_d, d_in)
    k_pad, n_pad = w_prep.shape
    assert b_prep.shape == (1, n_pad)
    out_dtype = x.dtype if out_dtype is None else out_dtype
    act_fn = _ACTIVATIONS[act]

    # ---- N axis: 128-multiple tile that exactly tiles the padded weight N.
    tile_n = _largest_aligned_divisor(n_pad, max(128, tile_n))
    grid_n = n_pad // tile_n

    # ---- K axis: whole when small enough, else 128-multiple divisor tiles.
    if k_pad <= k_whole_max:
        tile_k = k_pad
        grid_k = 1
    else:
        tile_k = _largest_aligned_divisor(k_pad, max(128, tile_k))
        grid_k = k_pad // tile_k
    if k_pad != d_in:
        # TODO(synk): rare path (d_in > k_whole_max and not 128-aligned); an
        # in-kernel K-remainder mask would avoid this per-call pad copy of x.
        x = jnp.pad(x, ((0, 0), (0, k_pad - d_in)))

    # ---- Per-generation VMEM budget and M-axis tile.
    x_bytes = jnp.dtype(x.dtype).itemsize
    w_bytes = jnp.dtype(w_prep.dtype).itemsize
    out_bytes = jnp.dtype(out_dtype).itemsize
    align_m = 16 if w_bytes == 2 else 8  # bf16 packs 16 rows / vreg
    vmem_limit, vmem_budget = _vmem_budget_bytes()

    def _footprint(tm, tn):
        f = (
            2 * tm * tile_k * x_bytes      # x tiles (double-buffered)
            + 2 * tile_k * tn * w_bytes    # w tiles (double-buffered)
            + 2 * tm * tn * out_bytes      # out tiles (double-buffered)
            + 2 * tn * 4                   # bias tiles
        )
        if grid_k > 1:
            f += tm * tn * 4               # f32 accumulator scratch
        return f

    tm_cap = min(tile_m, _round_up(M, align_m))
    tm_cap = max(align_m, (tm_cap // align_m) * align_m)
    while tm_cap > 128 and _footprint(tm_cap, tile_n) > vmem_budget:
        tm_cap = max(128, ((tm_cap // 2) // align_m) * align_m)
    while tile_n > 128 and _footprint(tm_cap, tile_n) > vmem_budget:
        tile_n = _largest_aligned_divisor(n_pad, tile_n - 128)
    grid_n = n_pad // tile_n

    if M <= tm_cap:
        tile_m = M
    else:
        tile_m = tm_cap
        cand = tm_cap
        while cand * 2 > tm_cap:           # prefer a divisor of M (no partial
            if M % cand == 0:              # trailing M block) if one is close
                tile_m = cand
                break
            cand -= align_m
    grid_m = pl.cdiv(M, tile_m)

    # Give the two v7x TensorCores >= 2 parallel tiles when the problem is big
    # enough to amortize the extra grid step (harmless on 1-TC chips).
    if grid_m * grid_n == 1 and M >= 2 * align_m and M * n_pad >= 512 * 128:
        tile_m = _round_up(pl.cdiv(M, 2), align_m)
        grid_m = pl.cdiv(M, tile_m)

    # ---- Cost estimate (accounts for padding and x/w re-reads).
    cost = pl.CostEstimate(
        flops=2 * M * k_pad * n_pad,
        transcendentals=0 if act in ("relu", "identity") else M * n_pad,
        bytes_accessed=(
            grid_n * M * k_pad * x_bytes        # x re-read per N tile
            + grid_m * k_pad * n_pad * w_bytes  # w re-read per M tile
            + M * size * out_bytes
            + grid_m * n_pad * 4                # bias re-read per M tile
        ),
    )

    if grid_k == 1:
        kernel = functools.partial(_single_k_kernel, act_fn)
        grid = (grid_m, grid_n)
        in_specs = [
            pl.BlockSpec((tile_m, tile_k), lambda i, j: (i, 0)),
            pl.BlockSpec((tile_k, tile_n), lambda i, j: (0, j)),
            pl.BlockSpec((1, tile_n), lambda i, j: (0, j)),
        ]
        out_specs = pl.BlockSpec((tile_m, tile_n), lambda i, j: (i, j))
        scratch_shapes = []
        dim_sem = ("parallel", "parallel")
    else:
        kernel = functools.partial(_multi_k_kernel, act_fn)
        grid = (grid_m, grid_n, grid_k)
        in_specs = [
            pl.BlockSpec((tile_m, tile_k), lambda i, j, k: (i, k)),
            pl.BlockSpec((tile_k, tile_n), lambda i, j, k: (k, j)),
            pl.BlockSpec((1, tile_n), lambda i, j, k: (0, j)),
        ]
        out_specs = pl.BlockSpec((tile_m, tile_n), lambda i, j, k: (i, j))
        scratch_shapes = [pltpu.VMEM((tile_m, tile_n), jnp.float32)]
        dim_sem = ("parallel", "parallel", "arbitrary")

    # Output array is unpadded (M, size): the padded weight columns only
    # produce out-of-bounds output columns, which the output DMA clips, so no
    # post-kernel slice copy is needed and in-kernel stores stay full-width.
    return pl.pallas_call(
        kernel,
        out_shape=jax.ShapeDtypeStruct((M, size), out_dtype),
        grid_spec=pltpu.PrefetchScalarGridSpec(
            num_scalar_prefetch=0,
            grid=grid,
            in_specs=in_specs,
            out_specs=out_specs,
            scratch_shapes=scratch_shapes,
        ),
        compiler_params=pltpu.CompilerParams(
            dimension_semantics=dim_sem,
            vmem_limit_bytes=vmem_limit,
        ),
        cost_estimate=cost,
    )(x, w_prep, b_prep)


def basic_mlp_block(
    x,
    w_t,
    b,
    *,
    act="relu",
    compute_dtype=jnp.bfloat16,
    out_dtype=None,
    tile_m=1024,
    tile_n=512,
    tile_k=512,
    k_whole_max=2048,
):
    """act(x @ w_t + b) with x:(M, d_in), w_t:(d_in, size), b:(size,).

    Convenience wrapper: for repeated calls hoist prepare_mlp_params() out of
    the hot path (the weight/bias are static) and call
    basic_mlp_block_prepared directly.
    """
    d_in, size = w_t.shape
    w_prep, b_prep = prepare_mlp_params(
        w_t, b, compute_dtype=compute_dtype, k_whole_max=k_whole_max
    )
    return basic_mlp_block_prepared(
        x, w_prep, b_prep,
        d_in=d_in, size=size, act=act, out_dtype=out_dtype,
        tile_m=tile_m, tile_n=tile_n, tile_k=tile_k, k_whole_max=k_whole_max,
    )


# ----------------------------------------------------------------------------
# Demo / self-test
# ----------------------------------------------------------------------------
def _reference(x, w_t, b, act="relu"):
    return _ACTIVATIONS[act](x @ w_t + b[None, :])


if __name__ == "__main__":
    key = jax.random.PRNGKey(0)

    # --- Case 1: small shapes consistent with the module (batch=8, d_in=32,
    # size=64).  Single grid point, N padded to 128 in the (one-time) weight
    # prep, output clipped by the writeback DMA (no slice copy).
    k_x, k_w, k_b = jax.random.split(key, 3)
    batch, d_in, size = 8, 32, 64
    x = jax.random.normal(k_x, (batch, d_in), dtype=jnp.float32)
    weight = jax.random.normal(k_w, (size, d_in), dtype=jnp.float32) * 0.1
    bias = jax.random.normal(k_b, (size,), dtype=jnp.float32) * 0.1
    w_t = weight.T

    ref1 = _reference(x, w_t, bias)

    out_f32 = jax.block_until_ready(
        basic_mlp_block(x, w_t, bias, compute_dtype=jnp.float32)
    )
    assert out_f32.shape == (batch, size)
    assert jnp.allclose(out_f32, ref1, atol=1e-5, rtol=1e-5), "f32 mismatch"

    # Configurable activation (module's act comes from get_func()).
    out_tanh = jax.block_until_ready(
        basic_mlp_block(x, w_t, bias, act="tanh", compute_dtype=jnp.float32)
    )
    assert jnp.allclose(out_tanh, _reference(x, w_t, bias, "tanh"),
                        atol=1e-4, rtol=1e-4), "tanh mismatch"

    # bf16 MXU path with the weight cast/pad hoisted out of the hot path.
    w_prep, b_prep = prepare_mlp_params(w_t, bias)
    run = jax.jit(functools.partial(
        basic_mlp_block_prepared, d_in=d_in, size=size))
    out_bf16 = jax.block_until_ready(run(x, w_prep, b_prep))
    assert out_bf16.shape == (batch, size)
    assert jnp.allclose(out_bf16, ref1, atol=5e-2, rtol=5e-2), "bf16 mismatch"

    # --- Case 2: realistic awkward shapes (M=200, d_in=700, size=320).
    k_x2, k_w2, k_b2 = jax.random.split(jax.random.PRNGKey(1), 3)
    batch2, d_in2, size2 = 200, 700, 320
    x2 = jax.random.normal(k_x2, (batch2, d_in2), dtype=jnp.float32)
    w2 = jax.random.normal(k_w2, (size2, d_in2), dtype=jnp.float32) * 0.05
    b2 = jax.random.normal(k_b2, (size2,), dtype=jnp.float32) * 0.1
    w2_t = w2.T
    ref2 = _reference(x2, w2_t, b2)

    # 2a: default path -> K kept whole (no x pad, no accumulator scratch),
    # n_pad=384 with tile_n=384, >=2 parallel M tiles for v7x megacore.
    out2 = jax.block_until_ready(basic_mlp_block(x2, w2_t, b2))
    assert out2.shape == (batch2, size2)
    assert jnp.allclose(out2, ref2, atol=5e-2, rtol=5e-2), "whole-K mismatch"

    # 2b: force the tiled-K accumulation path (k_pad=768, tile_k=256, 3 steps)
    # plus tiled M and N with edge masking.
    out2k = jax.block_until_ready(
        basic_mlp_block(x2, w2_t, b2, tile_m=128, tile_n=256, tile_k=256,
                        k_whole_max=256)
    )
    assert out2k.shape == (batch2, size2)
    assert jnp.allclose(out2k, ref2, atol=5e-2, rtol=5e-2), "tiled-K mismatch"

    print("KERNEL_OK")
</pallas_src>

<mosaic_0001>
module attributes {stable_mosaic.version = 11 : i64} {
  func.func @_single_k_kernel(%arg0: i32, %arg1: i32, %arg2: memref<8x32xf32, #tpu.memory_space<vmem>>, %arg3: memref<32x128xf32, #tpu.memory_space<vmem>>, %arg4: memref<1x128xf32, #tpu.memory_space<vmem>>, %arg5: memref<8x128xf32, #tpu.memory_space<vmem>>) attributes {dimension_semantics = [#tpu.dimension_semantics<parallel>, #tpu.dimension_semantics<parallel>], iteration_bounds = array<i64: 1, 1>, scalar_prefetch = 0 : i64, scratch_operands = 0 : i64, tpu.core_type = #tpu.core_type<tc>, window_params = [{transform_indices = @transform_0, window_bounds = array<i64: 8, 32>}, {transform_indices = @transform_1, window_bounds = array<i64: 32, 128>}, {transform_indices = @transform_2, window_bounds = array<i64: 1, 128>}, {transform_indices = @transform_3, window_bounds = array<i64: 8, 128>}]} {
    %c0 = arith.constant 0 : index
    %c0_0 = arith.constant 0 : index
    %0 = vector.load %arg2[%c0, %c0_0] : memref<8x32xf32, #tpu.memory_space<vmem>>, vector<8x32xf32>
    %c0_1 = arith.constant 0 : index
    %c0_2 = arith.constant 0 : index
    %1 = vector.load %arg3[%c0_1, %c0_2] : memref<32x128xf32, #tpu.memory_space<vmem>>, vector<32x128xf32>
    %cst = arith.constant dense<0.000000e+00> : vector<8x128xf32>
    %2 = tpu.matmul %0, %1, %cst {dimension_numbers = #tpu.dot_dimension_numbers<[1], [0], [0], [1], [0, 0, 1, 1], [], []>} : vector<8x32xf32>, vector<32x128xf32>, vector<8x128xf32> -> vector<8x128xf32>
    %c0_3 = arith.constant 0 : index
    %c0_4 = arith.constant 0 : index
    %3 = vector.load %arg4[%c0_3, %c0_4] : memref<1x128xf32, #tpu.memory_space<vmem>>, vector<1x128xf32>
    %4 = vector.broadcast %3 : vector<1x128xf32> to vector<8x128xf32>
    %5 = arith.addf %2, %4 : vector<8x128xf32>
    %cst_5 = arith.constant 0.000000e+00 : f32
    %6 = vector.broadcast %cst_5 : f32 to vector<8x128xf32>
    %7 = arith.maximumf %5, %6 : vector<8x128xf32>
    %c0_6 = arith.constant 0 : index
    %c0_7 = arith.constant 0 : index
    %8 = vector.load %arg5[%c0_6, %c0_7] : memref<8x128xf32, #tpu.memory_space<vmem>>, vector<8x128xf32>
    tpu.vector_store %arg5[%c0_6, %c0_7], %7 {strides = array<i32>} : memref<8x128xf32, #tpu.memory_space<vmem>>, vector<8x128xf32>,
    return
  }
  func.func @transform_0(%arg0: i32, %arg1: i32) -> (i32, i32) {
    %c0_i32 = arith.constant 0 : i32
    %c0_i32_0 = arith.constant 0 : i32
    return %arg0, %c0_i32 : i32, i32
  }
  func.func @transform_1(%arg0: i32, %arg1: i32) -> (i32, i32) {
    %c0_i32 = arith.constant 0 : i32
    %c0_i32_0 = arith.constant 0 : i32
    return %c0_i32, %arg1 : i32, i32
  }
  func.func @transform_2(%arg0: i32, %arg1: i32) -> (i32, i32) {
    %c0_i32 = arith.constant 0 : i32
    %c0_i32_0 = arith.constant 0 : i32
    return %c0_i32, %arg1 : i32, i32
  }
  func.func @transform_3(%arg0: i32, %arg1: i32) -> (i32, i32) {
    %c0_i32 = arith.constant 0 : i32
    return %arg0, %arg1 : i32, i32
  }
}

</mosaic_0001>

<bundles_post_ra>
// kernel: tpu_custom_call.1
= control target key start
LH: loop header
LB: loop body
LE: loop exit
PB: predicated region body
PF: predicated region fallthrough
CT: control target
= control target key end

     0   :  { %8 = vsyncpa [#allocation3], 0  ;;  %s275_s0 = inlined_call_operand.hbm [shape: f32[8,32], index: 0, kind: input, shape index: {}]   ;;  %s276_s1 = inlined_call_operand.hbm [shape: f32[32,128], index: 1, kind: input, shape index: {}]   ;;  %s277_s2 = inlined_call_operand.vmem [shape: f32[1,128], index: 2, kind: input, shape index: {}]   ;;  %s278_s3 = inlined_call_operand.hbm [shape: f32[8,64], index: 3, kind: output, shape index: {}]  }
   0x1   :  { %9 = vsyncpa [#allocation6], 0 }
   0x2   :  { %10 = vsyncpa [#allocation4], 0  ;;  %s236_s12 = smov [#allocation2]   ;;  %s237_s14 = smov [#allocation5]  }
   0x3   :  { %s17_s13 = sshll.u32 %s236_s12, 4  ;;  %s26_s15 = sshll.u32 %s237_s14, 4  ;;  %s18_s13 = int_to_ptr.vmem [resolvable:$true] %s17_s13  ;;  %s27_s15 = int_to_ptr.vmem [resolvable:$true] %s26_s15 }
   0x4   :  { %s178_s16 = scalar_lea.vmem %s18_s13, 128  ;;  %p183_p1 = scmp.lt.s32.totalorder %s18_s13, %s18_s13 }
   0x5   :  { %p179_p0 = scmp.ne.s32.totalorder %s18_s13, %s178_s16  ;;  %p184_p2 = scmp.lt.s32.totalorder %s178_s16, %s178_s16 }
   0x7   :  { %p185_p3 = por %p184_p2, %p183_p1 }
   0x9   :  { %p186_p4 = pnand %p185_p3, %p179_p0 }
   0xb   :  { %189 = shalt.err (!%p186_p4)
}
   0xc   :  { %20 = dma.hbm_to_vmem [thread:$0]  %s275_s0, 128, %s18_s13, [#allocation3]  }
   0xd   :  { %s198_s19 = scalar_lea.vmem %s27_s15, 512  ;;  %p203_p6 = scmp.lt.s32.totalorder %s27_s15, %s27_s15 }
   0xe   :  { %p199_p5 = scmp.ne.s32.totalorder %s27_s15, %s198_s19  ;;  %p204_p7 = scmp.lt.s32.totalorder %s198_s19, %s198_s19 }
  0x10   :  { %p205_p8 = por %p204_p7, %p203_p6 }
  0x12   :  { %p206_p9 = pnand %p205_p8, %p199_p5 }
  0x14   :  { %209 = shalt.err (!%p206_p9)
}
  0x15   :  { %s238_s20 = smov 128   ;;  %s239_s21 = smov 8  }
  0x16   :  { %32 = dma.hbm_to_vmem [thread:$0]  %s276_s1, 512, %s27_s15, [#allocation6], %s238_s20, %s238_s20, %s239_s21  }
  0x17   :  { %230 = dma.done.wait [#allocation3], 128  }
  0x18   :  { %231 = vsyncadd [#allocation3], 4294967168 }
  0x19   :  { %232 = dma.done.wait [#allocation6], 512  }
  0x1a   :  { %233 = vsyncadd [#allocation6], 4294966784  ;;  %v240_v0 = vmov 0.0   ;;  %vm241_vm0 = vmmov 0   ;;  %v45_v1 = vld [vmem:[#allocation5 + $0x18] sm:$0xff]  ;;  %v44_v2 = vld [vmem:[#allocation5 + $0x10] sm:$0xff] }
  0x1b   :  { %152 = vmatprep.subr.mxu0 %v240_v0  ;;  %160 = vmatprep.mubr.msk.f32.mxu0 %vm241_vm0, %v240_v0  ;;  %v43_v3 = vld [vmem:[#allocation5 + $0x8] sm:$0xff]  ;;  %v42_v4 = vld [vmem:[#allocation5] sm:$0xff]  ;;  %v41_v5 = vld [vmem:[#allocation2] sm:$0xff]  ;;  %vm53_vm1 = vcmask 261120   ;;  %s242_s24 = smov [#allocation7]  }
  0x1c   :  { %153 = vmatpush3.msra.mxu0 %v45_v1  ;;  %v145_v6 = vld [vmem:[%s277_s2] ss:$0 sm:$0xff]  ;;  %s135_s25 = sshll.u32 %s242_s24, 4  ;;  %s136_s25 = int_to_ptr.vmem [resolvable:$true] %s135_s25 }
  0x1d   :  { %154 = vmatprep.subr.mxu0 %v240_v0  ;;  %s210_s26 = scalar_lea.vmem %s136_s25, 128  ;;  %p215_p11 = scmp.lt.s32.totalorder %s136_s25, %s136_s25 }
  0x1e   :  { %155 = vmatpush3.msra.mxu0 %v44_v2  ;;  %p211_p10 = scmp.ne.s32.totalorder %s136_s25, %s210_s26  ;;  %p216_p12 = scmp.lt.s32.totalorder %s210_s26, %s210_s26 }
  0x1f   :  { %156 = vmatprep.subr.mxu0 %v240_v0 }
  0x20   :  { %157 = vmatpush3.msra.mxu0 %v43_v3  ;;  %p217_p13 = por %p216_p12, %p215_p11 }
  0x21   :  { %158 = vmatprep.subr.mxu0 %v240_v0 }
  0x22   :  { %159 = vmatpush3.msra.mxu0 %v42_v4  ;;  %p218_p0 = pnand %p217_p13, %p211_p10 }
  0x23   :  { %161 = vmatmul.mubr.msk.f32.vlgmr.msra.gmra.mxu0 %vm53_vm1, %v41_v5 }
  0xe3   :  { %v123_v7 = vpop.f32.mrf.mxu0 }
  0xe4   :  { %v124_v8 = vadd.f32 %v145_v6, %v123_v7 }
  0xe5   :  { %v162_v9 = vpop.f32.mrf.mxu0 }
  0xe6   :  { %v127_v10 = vmax.f32 %v124_v8, 0.0 }
  0xe8   :  { %128 = vst [vmem:[#allocation7] sm:$0xff] %v127_v10 }
  0xe9   :  { %221 = shalt.err (!%p218_p0)
}
  0xea   :  { %138 = dma.vmem_to_hbm [thread:$0]  %s136_s25, 128, %s278_s3, [#allocation4]  }
  0xeb   :  { %234 = dma.done.wait [#allocation4], 128  }
  0xec   :  { %235 = vsyncadd [#allocation4], 4294967168 }
  0xed   :  { %142 = vsyncpa [#allocation3], 1 }
  0xee   :  { %143 = vsyncpa [#allocation6], 1 }
  0xef   :  { %144 = vsyncpa [#allocation4], 1 }

</bundles_post_ra>
